<compile_context>
chip_gen: v7x
topology: tpu7x:2x2x1
jax: 0.10.0
libtpu: 0.0.40
codegen_flags: <defaults>
</compile_context>

<pallas_src>
import functools

import jax
import jax.numpy as jnp
from jax.experimental import pallas as pl
from jax.experimental.pallas import tpu as pltpu

_LANES = 128


def _vmem_budget():
    """Per-generation sizing: v5e/v6e have 128 MiB VMEM, v7x has 64 MiB."""
    try:
        cap = int(getattr(pltpu.get_tpu_info(), "vmem_capacity_bytes",
                          64 * 1024 * 1024))
    except Exception:
        cap = 64 * 1024 * 1024           # conservative fallback (v7x size)
    block_budget = min(8 * 1024 * 1024, cap // 16)   # combined (y, contours) block bytes
    vmem_limit = min(cap * 3 // 4, 96 * 1024 * 1024)  # 48 MiB on v7x, 96 MiB on v5e/v6e
    return block_budget, vmem_limit


def _sublane_multiple(*dtypes):
    """Depth-tile granularity implied by (8,128) tiling and sub-32-bit packing."""
    m = 8
    for dt in dtypes:
        m = max(m, 32 // max(1, jnp.dtype(dt).itemsize))
    return m


def _plan_depth(depth, plane_bytes, budget, sub):
    """Return (padded_depth, block_depth) for depth-plane blocks."""
    if depth * plane_bytes <= budget:
        return depth, depth                       # whole depth in one block
    d_pad = -(-depth // sub) * sub                # round up so tiles stay aligned
    best = 0
    for td in range(sub, d_pad + 1, sub):
        if d_pad % td == 0 and td * plane_bytes <= budget:
            best = td
    if best == 0:
        best = sub                                # huge planes: smallest legal tile
    return d_pad, best


def _smoothness_kernel(y_ref, c_ref, out_ref, acc_d, acc_h, acc_w, prev_ref, *,
                       width):
    """Fused |finite diff * shifted (1 - contours)| partial sums for one (b, c)."""
    di = pl.program_id(1)
    nd = pl.num_programs(1)

    x = y_ref[0].astype(jnp.float32)              # (td, H*W)
    m = 1.0 - c_ref[0].astype(jnp.float32)        # segments mask built in-kernel
    td, hw = x.shape

    @pl.when(di == 0)
    def _init():
        acc_d[...] = jnp.zeros_like(acc_d)
        acc_h[...] = jnp.zeros_like(acc_h)
        acc_w[...] = jnp.zeros_like(acc_w)
        prev_ref[...] = x[0:1, :]                 # first plane's D-diff is exactly 0

    lane = jax.lax.broadcasted_iota(jnp.int32, (td, hw), 1)

    # W axis (fast axis of the flattened plane): lane roll by 1 (XLU), mask the
    # wrapped first column of every row (lane % W == 0).
    if width > 1:
        dw = x - pltpu.roll(x, 1, 1)
        acc_w[...] += jnp.sum(
            jnp.where(lane % width != 0, jnp.abs(dw) * m, 0.0),
            axis=0, keepdims=True)

    # H axis: lane roll by W inside the flattened plane, mask the wrapped first
    # row (lane < W).
    if hw > width:
        dh = x - pltpu.roll(x, width, 1)
        acc_h[...] += jnp.sum(
            jnp.where(lane >= width, jnp.abs(dh) * m, 0.0),
            axis=0, keepdims=True)

    # D axis: sublane roll by 1; the wrapped row 0 is replaced by the previous
    # depth plane carried across depth blocks in VMEM scratch.
    prev_plane = prev_ref[...]                    # (1, H*W)
    if td > 1:
        row0 = jax.lax.broadcasted_iota(jnp.int32, (td, hw), 0) == 0
        x_up = jnp.where(row0, jnp.broadcast_to(prev_plane, (td, hw)),
                         pltpu.roll(x, 1, 0))
    else:
        x_up = prev_plane
    acc_d[...] += jnp.sum(jnp.abs(x - x_up) * m, axis=0, keepdims=True)
    prev_ref[...] = x[td - 1:td, :]

    # One cross-lane reduction + lane-dense store per (b, c).
    @pl.when(di == nd - 1)
    def _finalize():
        lanes = out_ref.shape[2]
        out_ref[...] = jnp.concatenate(
            [jnp.full((1, 1, lanes), jnp.sum(acc_d[...]), jnp.float32),
             jnp.full((1, 1, lanes), jnp.sum(acc_h[...]), jnp.float32),
             jnp.full((1, 1, lanes), jnp.sum(acc_w[...]), jnp.float32)],
            axis=1)


def spatial_segment_smoothness(y_pred, y_true, contours, n_dims=3, lambda_i=1.0):
    """Matches SpatialSegmentSmoothness.forward (y_true, lambda_i unused there)."""
    del y_true, lambda_i  # not used by the reference forward pass
    if n_dims != 3:
        # TODO(synk): fused kernel assumes volumetric NCDHW (n_dims == 3).
        raise NotImplementedError("fused Pallas kernel implemented for n_dims == 3")

    B, C, D, H, W = y_pred.shape
    BC = B * C
    HW = H * W

    # Free reshapes (contiguous dims only).  Pass `contours` in a narrow dtype
    # (bf16 / int8 — exact for a 0/1 mask) from the producer for ~25-37% less
    # HBM traffic; the kernel casts in-VMEM either way.
    y3 = y_pred.reshape(BC, D, HW)
    c3 = contours.reshape(BC, D, HW)

    block_budget, vmem_limit = _vmem_budget()
    plane_bytes = HW * (y3.dtype.itemsize + c3.dtype.itemsize)
    sub = _sublane_multiple(y3.dtype, c3.dtype)
    d_pad, td = _plan_depth(D, plane_bytes, block_budget, sub)
    if d_pad != D:
        # Padded depth planes are masked out exactly: contours=1 -> mask=0.
        y3 = jnp.pad(y3, ((0, 0), (0, d_pad - D), (0, 0)))
        c3 = jnp.pad(c3, ((0, 0), (0, d_pad - D), (0, 0)), constant_values=1)

    grid = (BC, d_pad // td)
    # TODO(synk): for tiny B*C on v7x, emit per-depth-block partials so the depth
    # axis can also be "parallel" (second TensorCore coverage).

    out = pl.pallas_call(
        functools.partial(_smoothness_kernel, width=W),
        out_shape=jax.ShapeDtypeStruct((BC, 3, _LANES), jnp.float32),
        grid_spec=pltpu.PrefetchScalarGridSpec(
            num_scalar_prefetch=0,
            grid=grid,
            in_specs=[
                pl.BlockSpec((1, td, HW), lambda bc, di: (bc, di, 0)),
                pl.BlockSpec((1, td, HW), lambda bc, di: (bc, di, 0)),
            ],
            out_specs=pl.BlockSpec((1, 3, _LANES), lambda bc, di: (bc, 0, 0)),
            scratch_shapes=[
                pltpu.VMEM((1, HW), jnp.float32),   # acc_d
                pltpu.VMEM((1, HW), jnp.float32),   # acc_h
                pltpu.VMEM((1, HW), jnp.float32),   # acc_w
                pltpu.VMEM((1, HW), jnp.float32),   # carried previous depth plane
            ],
        ),
        compiler_params=pltpu.CompilerParams(
            dimension_semantics=("parallel", "arbitrary"),
            vmem_limit_bytes=vmem_limit,
        ),
    )(y3, c3)

    per_bc = out[:, :, 0]                 # (BC, 3): [sum_D, sum_H, sum_W] per (b, c)
    totals = jnp.sum(per_bc, axis=0)      # (3,)

    cnt_d = BC * (D - 1) * H * W
    cnt_h = BC * D * (H - 1) * W
    cnt_w = BC * D * H * (W - 1)

    loss = jnp.float32(0.0)
    if cnt_d > 0:
        loss = loss + totals[0] / jnp.float32(cnt_d)   # torch d=1 (D axis)
    if cnt_h > 0:
        loss = loss + totals[1] / jnp.float32(cnt_h)   # torch d=2 (H axis)
    if cnt_w > 0:
        loss = loss + totals[2] / jnp.float32(cnt_w)   # torch d=3 (W axis)
    return loss


def _reference(y_pred, contours, n_dims=3):
    """Pure-JAX reference of the PyTorch forward."""
    mask = 1.0 - contours
    loss = jnp.float32(0.0)
    for d in range(1, n_dims + 1):
        ax = d + 1
        n = y_pred.shape[ax]
        a = jax.lax.slice_in_dim(y_pred, 1, n, axis=ax)
        b = jax.lax.slice_in_dim(y_pred, 0, n - 1, axis=ax)
        ms = jax.lax.slice_in_dim(mask, 1, n, axis=ax)
        loss = loss + jnp.mean(jnp.abs((a - b) * ms))
    return loss


if __name__ == "__main__":
    key = jax.random.PRNGKey(0)
    k1, k2, k3 = jax.random.split(key, 3)

    B, C, D, H, W = 2, 3, 8, 16, 16
    y_pred = jax.random.normal(k1, (B, C, D, H, W), dtype=jnp.float32)
    y_true = jax.random.normal(k2, (B, C, D, H, W), dtype=jnp.float32)
    # Binary contour mask shipped in bf16 (exact for 0/1 values) -> half the
    # HBM read traffic of the mask in this bandwidth-bound kernel.
    contours = (jax.random.uniform(k3, (B, C, D, H, W)) > 0.7).astype(jnp.bfloat16)

    loss = spatial_segment_smoothness(y_pred, y_true, contours)
    loss = jax.block_until_ready(loss)

    ref = _reference(y_pred, contours.astype(jnp.float32))
    assert jnp.allclose(loss, ref, rtol=1e-5, atol=1e-5), (float(loss), float(ref))
    print("KERNEL_OK")
</pallas_src>

<mosaic_0001>
module attributes {stable_mosaic.version = 11 : i64} {
  func.func @_smoothness_kernel(%arg0: i32, %arg1: i32, %arg2: memref<1x8x256xf32, #tpu.memory_space<vmem>>, %arg3: memref<1x8x256xbf16, #tpu.memory_space<vmem>>, %arg4: memref<1x3x128xf32, #tpu.memory_space<vmem>>, %arg5: memref<1x256xf32, #tpu.memory_space<vmem>>, %arg6: memref<1x256xf32, #tpu.memory_space<vmem>>, %arg7: memref<1x256xf32, #tpu.memory_space<vmem>>, %arg8: memref<1x256xf32, #tpu.memory_space<vmem>>) attributes {dimension_semantics = [#tpu.dimension_semantics<parallel>, #tpu.dimension_semantics<arbitrary>], iteration_bounds = array<i64: 6, 1>, scalar_prefetch = 0 : i64, scratch_operands = 4 : i64, tpu.core_type = #tpu.core_type<tc>, window_params = [{transform_indices = @transform_0, window_bounds = array<i64: 1, 8, 256>}, {transform_indices = @transform_1, window_bounds = array<i64: 1, 8, 256>}, {transform_indices = @transform_2, window_bounds = array<i64: 1, 3, 128>}]} {
    %c0 = arith.constant 0 : index
    %c0_0 = arith.constant 0 : index
    %c0_1 = arith.constant 0 : index
    %0 = vector.load %arg2[%c0, %c0_0, %c0_1] : memref<1x8x256xf32, #tpu.memory_space<vmem>>, vector<1x8x256xf32>
    %1 = vector.shape_cast %0 : vector<1x8x256xf32> to vector<8x256xf32>
    %c0_2 = arith.constant 0 : index
    %c0_3 = arith.constant 0 : index
    %c0_4 = arith.constant 0 : index
    %2 = vector.load %arg3[%c0_2, %c0_3, %c0_4] : memref<1x8x256xbf16, #tpu.memory_space<vmem>>, vector<1x8x256xbf16>
    %3 = vector.shape_cast %2 : vector<1x8x256xbf16> to vector<8x256xbf16>
    %4 = arith.extf %3 : vector<8x256xbf16> to vector<8x256xf32>
    %cst = arith.constant 1.000000e+00 : f32
    %5 = vector.broadcast %cst : f32 to vector<8x256xf32>
    %6 = arith.subf %5, %4 : vector<8x256xf32>
    %c0_i32 = arith.constant 0 : i32
    %7 = arith.cmpi eq, %arg1, %c0_i32 : i32
    %8 = arith.extui %7 : i1 to i32
    %c0_i32_5 = arith.constant 0 : i32
    %9 = arith.cmpi ne, %8, %c0_i32_5 : i32
    scf.if %9 {
      %cst_39 = arith.constant 0.000000e+00 : f32
      %74 = vector.broadcast %cst_39 : f32 to vector<1x256xf32>
      %c0_40 = arith.constant 0 : index
      %c0_41 = arith.constant 0 : index
      %75 = vector.load %arg5[%c0_40, %c0_41] : memref<1x256xf32, #tpu.memory_space<vmem>>, vector<1x256xf32>
      tpu.vector_store %arg5[%c0_40, %c0_41], %74 {strides = array<i32>} : memref<1x256xf32, #tpu.memory_space<vmem>>, vector<1x256xf32>,
      %cst_42 = arith.constant 0.000000e+00 : f32
      %76 = vector.broadcast %cst_42 : f32 to vector<1x256xf32>
      %c0_43 = arith.constant 0 : index
      %c0_44 = arith.constant 0 : index
      %77 = vector.load %arg6[%c0_43, %c0_44] : memref<1x256xf32, #tpu.memory_space<vmem>>, vector<1x256xf32>
      tpu.vector_store %arg6[%c0_43, %c0_44], %76 {strides = array<i32>} : memref<1x256xf32, #tpu.memory_space<vmem>>, vector<1x256xf32>,
      %cst_45 = arith.constant 0.000000e+00 : f32
      %78 = vector.broadcast %cst_45 : f32 to vector<1x256xf32>
      %c0_46 = arith.constant 0 : index
      %c0_47 = arith.constant 0 : index
      %79 = vector.load %arg7[%c0_46, %c0_47] : memref<1x256xf32, #tpu.memory_space<vmem>>, vector<1x256xf32>
      tpu.vector_store %arg7[%c0_46, %c0_47], %78 {strides = array<i32>} : memref<1x256xf32, #tpu.memory_space<vmem>>, vector<1x256xf32>,
      %80 = vector.extract_strided_slice %1 {offsets = [0, 0], sizes = [1, 256], strides = [1, 1]} : vector<8x256xf32> to vector<1x256xf32>
      %c0_48 = arith.constant 0 : index
      %c0_49 = arith.constant 0 : index
      %81 = vector.load %arg8[%c0_48, %c0_49] : memref<1x256xf32, #tpu.memory_space<vmem>>, vector<1x256xf32>
      tpu.vector_store %arg8[%c0_48, %c0_49], %80 {strides = array<i32>} : memref<1x256xf32, #tpu.memory_space<vmem>>, vector<1x256xf32>,
    } else {
    }
    %10 = tpu.iota {dimensions = array<i32: 1>} : vector<8x256xi32>
    %c1_i32 = arith.constant 1 : i32
    %11 = tpu.dynamic_rotate %1 by %c1_i32 dim 1 : vector<8x256xf32>, i32 -> vector<8x256xf32>
    %12 = arith.subf %1, %11 : vector<8x256xf32>
    %c0_6 = arith.constant 0 : index
    %c0_7 = arith.constant 0 : index
    %13 = vector.load %arg7[%c0_6, %c0_7] : memref<1x256xf32, #tpu.memory_space<vmem>>, vector<1x256xf32>
    %c16_i32 = arith.constant 16 : i32
    %c0_i32_8 = arith.constant 0 : i32
    %14 = arith.cmpi eq, %c16_i32, %c0_i32_8 : i32
    %c1_i32_9 = arith.constant 1 : i32
    %15 = arith.select %14, %c1_i32_9, %c16_i32 : i32
    %16 = vector.broadcast %15 : i32 to vector<8x256xi32>
    %17 = arith.remsi %10, %16 : vector<8x256xi32>
    %c0_i32_10 = arith.constant 0 : i32
    %18 = vector.broadcast %c0_i32_10 : i32 to vector<8x256xi32>
    %19 = arith.cmpi ne, %17, %18 : vector<8x256xi32>
    %c0_i32_11 = arith.constant 0 : i32
    %20 = vector.broadcast %c0_i32_11 : i32 to vector<8x256xi32>
    %21 = arith.cmpi slt, %17, %20 : vector<8x256xi32>
    %c0_i32_12 = arith.constant 0 : i32
    %22 = arith.cmpi slt, %15, %c0_i32_12 : i32
    %23 = vector.broadcast %22 : i1 to vector<8x256xi1>
    %24 = vector.broadcast %23 : vector<8x256xi1> to vector<8x256xi1>
    %25 = arith.xori %21, %24 : vector<8x256xi1>
    %26 = arith.andi %25, %19 : vector<8x256xi1>
    %27 = vector.broadcast %15 : i32 to vector<8x256xi32>
    %28 = arith.addi %17, %27 : vector<8x256xi32>
    %29 = arith.select %26, %28, %17 : vector<8x256xi1>, vector<8x256xi32>
    %c0_i32_13 = arith.constant 0 : i32
    %30 = vector.broadcast %c0_i32_13 : i32 to vector<8x256xi32>
    %31 = arith.cmpi ne, %29, %30 : vector<8x256xi32>
    %32 = math.absf %12 : vector<8x256xf32>
    %33 = arith.mulf %32, %6 : vector<8x256xf32>
    %cst_14 = arith.constant 0.000000e+00 : f32
    %34 = vector.broadcast %cst_14 : f32 to vector<8x256xf32>
    %35 = arith.select %31, %33, %34 : vector<8x256xi1>, vector<8x256xf32>
    %cst_15 = arith.constant dense<0.000000e+00> : vector<256xf32>
    %36 = vector.multi_reduction <add>, %35, %cst_15 [0] : vector<8x256xf32> to vector<256xf32>
    %37 = vector.shape_cast %36 : vector<256xf32> to vector<1x256xf32>
    %38 = arith.addf %13, %37 : vector<1x256xf32>
    %c0_16 = arith.constant 0 : index
    %c0_17 = arith.constant 0 : index
    %39 = vector.load %arg7[%c0_16, %c0_17] : memref<1x256xf32, #tpu.memory_space<vmem>>, vector<1x256xf32>
    tpu.vector_store %arg7[%c0_16, %c0_17], %38 {strides = array<i32>} : memref<1x256xf32, #tpu.memory_space<vmem>>, vector<1x256xf32>,
    %c16_i32_18 = arith.constant 16 : i32
    %40 = tpu.dynamic_rotate %1 by %c16_i32_18 dim 1 : vector<8x256xf32>, i32 -> vector<8x256xf32>
    %41 = arith.subf %1, %40 : vector<8x256xf32>
    %c0_19 = arith.constant 0 : index
    %c0_20 = arith.constant 0 : index
    %42 = vector.load %arg6[%c0_19, %c0_20] : memref<1x256xf32, #tpu.memory_space<vmem>>, vector<1x256xf32>
    %c16_i32_21 = arith.constant 16 : i32
    %43 = vector.broadcast %c16_i32_21 : i32 to vector<8x256xi32>
    %44 = arith.cmpi sge, %10, %43 : vector<8x256xi32>
    %45 = math.absf %41 : vector<8x256xf32>
    %46 = arith.mulf %45, %6 : vector<8x256xf32>
    %cst_22 = arith.constant 0.000000e+00 : f32
    %47 = vector.broadcast %cst_22 : f32 to vector<8x256xf32>
    %48 = arith.select %44, %46, %47 : vector<8x256xi1>, vector<8x256xf32>
    %cst_23 = arith.constant dense<0.000000e+00> : vector<256xf32>
    %49 = vector.multi_reduction <add>, %48, %cst_23 [0] : vector<8x256xf32> to vector<256xf32>
    %50 = vector.shape_cast %49 : vector<256xf32> to vector<1x256xf32>
    %51 = arith.addf %42, %50 : vector<1x256xf32>
    %c0_24 = arith.constant 0 : index
    %c0_25 = arith.constant 0 : index
    %52 = vector.load %arg6[%c0_24, %c0_25] : memref<1x256xf32, #tpu.memory_space<vmem>>, vector<1x256xf32>
    tpu.vector_store %arg6[%c0_24, %c0_25], %51 {strides = array<i32>} : memref<1x256xf32, #tpu.memory_space<vmem>>, vector<1x256xf32>,
    %c0_26 = arith.constant 0 : index
    %c0_27 = arith.constant 0 : index
    %53 = vector.load %arg8[%c0_26, %c0_27] : memref<1x256xf32, #tpu.memory_space<vmem>>, vector<1x256xf32>
    %54 = tpu.iota {dimensions = array<i32: 0>} : vector<8x256xi32>
    %c0_i32_28 = arith.constant 0 : i32
    %55 = vector.broadcast %c0_i32_28 : i32 to vector<8x256xi32>
    %56 = arith.cmpi eq, %54, %55 : vector<8x256xi32>
    %57 = vector.shape_cast %53 : vector<1x256xf32> to vector<1x256xf32>
    %58 = vector.broadcast %57 : vector<1x256xf32> to vector<8x256xf32>
    %c1_i32_29 = arith.constant 1 : i32
    %59 = tpu.dynamic_rotate %1 by %c1_i32_29 dim 0 : vector<8x256xf32>, i32 -> vector<8x256xf32>
    %60 = arith.select %56, %58, %59 : vector<8x256xi1>, vector<8x256xf32>
    %c0_30 = arith.constant 0 : index
    %c0_31 = arith.constant 0 : index
    %61 = vector.load %arg5[%c0_30, %c0_31] : memref<1x256xf32, #tpu.memory_space<vmem>>, vector<1x256xf32>
    %62 = arith.subf %1, %60 : vector<8x256xf32>
    %63 = math.absf %62 : vector<8x256xf32>
    %64 = arith.mulf %63, %6 : vector<8x256xf32>
    %cst_32 = arith.constant dense<0.000000e+00> : vector<256xf32>
    %65 = vector.multi_reduction <add>, %64, %cst_32 [0] : vector<8x256xf32> to vector<256xf32>
    %66 = vector.shape_cast %65 : vector<256xf32> to vector<1x256xf32>
    %67 = arith.addf %61, %66 : vector<1x256xf32>
    %c0_33 = arith.constant 0 : index
    %c0_34 = arith.constant 0 : index
    %68 = vector.load %arg5[%c0_33, %c0_34] : memref<1x256xf32, #tpu.memory_space<vmem>>, vector<1x256xf32>
    tpu.vector_store %arg5[%c0_33, %c0_34], %67 {strides = array<i32>} : memref<1x256xf32, #tpu.memory_space<vmem>>, vector<1x256xf32>,
    %69 = vector.extract_strided_slice %1 {offsets = [7, 0], sizes = [1, 256], strides = [1, 1]} : vector<8x256xf32> to vector<1x256xf32>
    %c0_35 = arith.constant 0 : index
    %c0_36 = arith.constant 0 : index
    %70 = vector.load %arg8[%c0_35, %c0_36] : memref<1x256xf32, #tpu.memory_space<vmem>>, vector<1x256xf32>
    tpu.vector_store %arg8[%c0_35, %c0_36], %69 {strides = array<i32>} : memref<1x256xf32, #tpu.memory_space<vmem>>, vector<1x256xf32>,
    %c0_i32_37 = arith.constant 0 : i32
    %71 = arith.cmpi eq, %arg1, %c0_i32_37 : i32
    %72 = arith.extui %71 : i1 to i32
    %c0_i32_38 = arith.constant 0 : i32
    %73 = arith.cmpi ne, %72, %c0_i32_38 : i32
    scf.if %73 {
      %c0_39 = arith.constant 0 : index
      %c0_40 = arith.constant 0 : index
      %74 = vector.load %arg5[%c0_39, %c0_40] : memref<1x256xf32, #tpu.memory_space<vmem>>, vector<1x256xf32>
      %75 = vector.shape_cast %74 : vector<1x256xf32> to vector<1x1x256xf32>
      %cst_41 = arith.constant dense<0.000000e+00> : vector<1xf32>
      %76 = vector.multi_reduction <add>, %75, %cst_41 [1, 2] : vector<1x1x256xf32> to vector<1xf32>
      %77 = vector.shape_cast %76 : vector<1xf32> to vector<1x1x1xf32>
      %78 = vector.extract %77[0, 0, 0] : f32 from vector<1x1x1xf32>
      %79 = vector.broadcast %78 : f32 to vector<1x1x128xf32>
      %c0_42 = arith.constant 0 : index
      %c0_43 = arith.constant 0 : index
      %80 = vector.load %arg6[%c0_42, %c0_43] : memref<1x256xf32, #tpu.memory_space<vmem>>, vector<1x256xf32>
      %81 = vector.shape_cast %80 : vector<1x256xf32> to vector<1x1x256xf32>
      %cst_44 = arith.constant dense<0.000000e+00> : vector<1xf32>
      %82 = vector.multi_reduction <add>, %81, %cst_44 [1, 2] : vector<1x1x256xf32> to vector<1xf32>
      %83 = vector.shape_cast %82 : vector<1xf32> to vector<1x1x1xf32>
      %84 = vector.extract %83[0, 0, 0] : f32 from vector<1x1x1xf32>
      %85 = vector.broadcast %84 : f32 to vector<1x1x128xf32>
      %c0_45 = arith.constant 0 : index
      %c0_46 = arith.constant 0 : index
      %86 = vector.load %arg7[%c0_45, %c0_46] : memref<1x256xf32, #tpu.memory_space<vmem>>, vector<1x256xf32>
      %87 = vector.shape_cast %86 : vector<1x256xf32> to vector<1x1x256xf32>
      %cst_47 = arith.constant dense<0.000000e+00> : vector<1xf32>
      %88 = vector.multi_reduction <add>, %87, %cst_47 [1, 2] : vector<1x1x256xf32> to vector<1xf32>
      %89 = vector.shape_cast %88 : vector<1xf32> to vector<1x1x1xf32>
      %90 = vector.extract %89[0, 0, 0] : f32 from vector<1x1x1xf32>
      %91 = vector.broadcast %90 : f32 to vector<1x1x128xf32>
      %92 = tpu.concatenate %79, %85, %91 in 1 : vector<1x1x128xf32>, vector<1x1x128xf32>, vector<1x1x128xf32> -> vector<1x3x128xf32>
      %c0_48 = arith.constant 0 : index
      %c0_49 = arith.constant 0 : index
      %c0_50 = arith.constant 0 : index
      %93 = vector.load %arg4[%c0_48, %c0_49, %c0_50] : memref<1x3x128xf32, #tpu.memory_space<vmem>>, vector<1x3x128xf32>
      tpu.vector_store %arg4[%c0_48, %c0_49, %c0_50], %92 {strides = array<i32>} : memref<1x3x128xf32, #tpu.memory_space<vmem>>, vector<1x3x128xf32>,
    } else {
    }
    return
  }
  func.func @transform_0(%arg0: i32, %arg1: i32) -> (i32, i32, i32) {
    %c0_i32 = arith.constant 0 : i32
    %c0_i32_0 = arith.constant 0 : i32
    return %arg0, %arg1, %c0_i32 : i32, i32, i32
  }
  func.func @transform_1(%arg0: i32, %arg1: i32) -> (i32, i32, i32) {
    %c0_i32 = arith.constant 0 : i32
    %c0_i32_0 = arith.constant 0 : i32
    return %arg0, %arg1, %c0_i32 : i32, i32, i32
  }
  func.func @transform_2(%arg0: i32, %arg1: i32) -> (i32, i32, i32) {
    %c0_i32 = arith.constant 0 : i32
    %c0_i32_0 = arith.constant 0 : i32
    %c0_i32_1 = arith.constant 0 : i32
    return %arg0, %c0_i32, %c0_i32_0 : i32, i32, i32
  }
}

</mosaic_0001>

<bundles_post_ra>
// kernel: tpu_custom_call.1
= control target key start
LH: loop header
LB: loop body
LE: loop exit
PB: predicated region body
PF: predicated region fallthrough
CT: control target
= control target key end

     0   :  { %7 = vsyncpa [#allocation7], 0  ;;  %s1236_s0 = inlined_call_operand.hbm [shape: f32[6,8,256], index: 0, kind: input, shape index: {}]   ;;  %s1237_s1 = inlined_call_operand.hbm [shape: bf16[6,8,256], index: 1, kind: input, shape index: {}]   ;;  %s1238_s2 = inlined_call_operand.hbm [shape: f32[6,3,128], index: 2, kind: output, shape index: {}]  }
   0x1   :  { %9 = vsyncpa [#allocation7 + $0x1], 0 }
   0x2   :  { %10 = vsyncpa [#allocation10], 0 }
   0x3   :  { %12 = vsyncpa [#allocation10 + $0x1], 0 }
   0x4   :  { %13 = vsyncpa [#allocation8], 0 }
   0x5   :  { %15 = vsyncpa [#allocation8 + $0x1], 0  ;;  %s938_s9 = smov 0   ;;  %s940_s10 = smov 0  }
   0x6   :  { %s942_s11 = smov 0   ;;  %s944_s12 = smov 0  }
   0x7   :  { %s946_s13 = smov 0   ;;  %s948_s14 = smov 0  }
   0x8 LB: > { %s669_s15 = sadd.s32 4294967295, %s914_s14   ;;  %s670_s16 = sadd.s32 4294967294, %s914_s14   ;;  %s914_s14 = sphi %s948_s14, %s21_s14   ;;  %s910_s13 = sphi %s946_s13, %s1259_s13   ;;  %s906_s12 = sphi %s944_s12, %s1258_s12   ;;  %s902_s11 = sphi %s942_s11, %s1257_s11   ;;  %s898_s10 = sphi %s940_s10, %s1256_s10   ;;  %s894_s9 = sphi %s938_s9, %s1255_s9  }
   0x9   : > { %s33_s17 = sadd.s32 1, %s910_s13  ;;  %s42_s18 = sadd.s32 1, %s902_s11 }
   0xa   : > { %p35_p0 = scmp.ge.s32.totalorder %s33_s17, 6  ;;  %p49_p1 = scmp.ne.s32.totalorder %s902_s11, %s898_s10 }
   0xb   : > { %p50_p2 = scmp.eq.s32.totalorder %s914_s14, 0  ;;  %p55_p3 = scmp.ne.s32.totalorder %s898_s10, %s894_s9 }
   0xc   : > { %s1261_s17 = smov (%p35_p0, %s33_s17), 0  ;;  %p56_p5 = scmp.eq.s32.totalorder %s669_s15, 0 }
   0xd   : > { %p979_p4 = por %p50_p2, %p49_p1  ;;  %s37_s20 = ssub.s32 %s910_s13, %s1261_s17 }
   0xe   : > { %p107_p6 = scmp.eq.s32.totalorder %s669_s15, 5  ;;  %p40_p7 = scmp.eq.s32.totalorder %s37_s20, 0 }
   0xf   : > { %p985_p8 = por %p56_p5, %p55_p3  ;;  %p113_p10 = scmp.eq.s32.totalorder %s670_s16, 5 }
  0x10   : > { %p989_p9 = por %p107_p6, %p49_p1  ;;  %p712_p12 = scmp.lt.s32.totalorder %s914_s14, 6 }
  0x11   : > { %s1242_s21 = scalar_select %p985_p8, 1, 0 }
  0x12   : > { %s1243_s22 = scalar_select %p989_p9, 1, 0 }
  0x13   : > { %s994_s23 = scalar_select %p40_p7, %s902_s11, %s42_s18  }
  0x14   : > { %p996_p11 = por %p113_p10, %p55_p3  ;;  %s1002_s25 = sand.u32 1, %s902_s11  }
  0x15   : > { %s673_s26 = sshll.u32 %s1002_s25, 4  ;;  %s687_s27 = sshll.u32 %s910_s13, 8 }
  0x16   : > { %s1244_s24 = scalar_select %p996_p11, 1, 0 }
  0x17   : > { %s1009_s30 = scalar_lea.hbm %s1236_s0, %s687_s27  ;;  %s137_s3 = scalar_lea.vmem [#allocation6], %s673_s26 }
  0x18   : > { %s147_s4 = sshll.u32 %s137_s3, 4  ;;  %p1015_p13 = pnand %p712_p12, %p979_p4  ;;  %s1011_s4 = int_to_ptr.vmem [resolvable:$true] %s147_s4 }
  0x19   : > { %s134_s6 = scalar_lea.sflag [#allocation7], %s1002_s25  ;;  %s768_s7 = scalar_lea.hbm %s1009_s30, 256 }
  0x1a   : > { %p769_p2 = scmp.ne.s32.totalorder %s1009_s30, %s768_s7  ;;  %p770_p3 = pneg %p1015_p13 }
  0x1b   : > { %s773_s16 = scalar_lea.hbm %s1236_s0, 1536  ;;  %p774_p4 = scmp.lt.u32.totalorder %s1009_s30, %s1236_s0 }
  0x1c   : > { %p771_p5 = pnand %p770_p3, %p769_p2  ;;  %p775_p7 = scmp.lt.u32.totalorder %s773_s16, %s768_s7 }
  0x1d   : > { %p777_p12 = scmp.lt.u32.totalorder %s768_s7, %s1009_s30 }
  0x1e   : > { %p772_p6 = pneg %p771_p5  ;;  %p776_p10 = por %p775_p7, %p774_p4 }
  0x20   : > { %p778_p0 = por %p777_p12, %p776_p10 }
  0x22   : > { %p779_p1 = pnand %p778_p0, %p772_p6 }
  0x24   : > { %782 = shalt.err (!%p779_p1)
}
  0x25   : > { %s783_s20 = scalar_lea.vmem %s1011_s4, 256  ;;  %s916_s26 = smov [#allocation6]  }
  0x26   : > { %p784_p2 = scmp.ne.s32.totalorder %s1011_s4, %s783_s20  ;;  %s788_s27 = sshll.u32 %s916_s26, 4  ;;  %s789_s27 = int_to_ptr.vmem [resolvable:$false] %s788_s27 }
  0x27   : > { %s790_s28 = scalar_lea.vmem %s789_s27, 512  ;;  %p791_p9 = scmp.lt.s32.totalorder %s1011_s4, %s789_s27 }
  0x28   : > { %p786_p5 = pnand %p784_p2, %p770_p3  ;;  %p792_p4 = scmp.lt.s32.totalorder %s790_s28, %s783_s20 }
  0x2a   : > { %p787_p11 = pneg %p786_p5  ;;  %p793_p7 = por %p792_p4, %p791_p9 }
  0x2c   : > { %p794_p10 = pnand %p793_p7, %p787_p11 }
  0x2e   : > { %797 = shalt.err (!%p794_p10)
}
  0x2f   : > { %704 = dma.hbm_to_vmem [thread:$0]  (!%p1015_p13), %s1009_s30, 256, %s1011_s4, %s134_s6  }
  0x30   : > { %p1246_p0 = scmp.lt.s32.totalorder %s914_s14, 7  ;;  %p1247_p1 = scmp.ge.s32.totalorder %s914_s14, 1 }
  0x31   : > { %s676_s3 = sshll.u32 %s1002_s25, 3  ;;  %s688_s7 = sshll.u32 %s910_s13, 7 }
  0x32   : > { %p1051_p6 = pnand %p1247_p1, %p1246_p0  ;;  %s1060_s16 = scalar_lea.hbm %s1237_s1, %s688_s7 }
  0x33   : > { %s158_s18 = scalar_lea.vmem [#allocation9], %s676_s3  ;;  %s155_s30 = scalar_lea.sflag [#allocation10], %s1002_s25 }
  0x34   : > { %s1248_s29 = scalar_select %p1051_p6, 1, 0 }
  0x35   : > { %s168_s19 = sshll.u32 %s158_s18, 4  ;;  %s798_s4 = scalar_lea.hbm %s1060_s16, 128  ;;  %s169_s19 = int_to_ptr.vmem [resolvable:$true] %s168_s19 }
  0x36   : > { %p799_p9 = scmp.ne.s32.totalorder %s1060_s16, %s798_s4  ;;  %s803_s26 = scalar_lea.hbm %s1237_s1, 768 }
  0x37   : > { %p804_p2 = scmp.lt.u32.totalorder %s1060_s16, %s1237_s1  ;;  %p805_p5 = scmp.lt.u32.totalorder %s803_s26, %s798_s4 }
  0x38   : > { %p801_p11 = pnand %p799_p9, %p770_p3  ;;  %p807_p7 = scmp.lt.u32.totalorder %s798_s4, %s1060_s16 }
  0x39   : > { %p806_p4 = por %p805_p5, %p804_p2 }
  0x3a   : > { %p802_p12 = pneg %p801_p11 }
  0x3b   : > { %p808_p10 = por %p807_p7, %p806_p4 }
  0x3d   : > { %p809_p0 = pnand %p808_p10, %p802_p12 }
  0x3f   : > { %812 = shalt.err (!%p809_p0)
}
  0x40   : > { %s813_s25 = scalar_lea.vmem %s169_s19, 128  ;;  %s917_s3 = smov [#allocation9]  }
  0x41   : > { %p814_p1 = scmp.ne.s32.totalorder %s169_s19, %s813_s25  ;;  %s818_s7 = sshll.u32 %s917_s3, 4  ;;  %s819_s7 = int_to_ptr.vmem [resolvable:$false] %s818_s7 }
  0x42   : > { %s820_s8 = scalar_lea.vmem %s819_s7, 256  ;;  %p821_p8 = scmp.lt.s32.totalorder %s169_s19, %s819_s7 }
  0x43   : > { %p816_p9 = pnand %p814_p1, %p770_p3  ;;  %p822_p6 = scmp.lt.s32.totalorder %s820_s8, %s813_s25 }
  0x45   : > { %p817_p11 = pneg %p816_p9  ;;  %p823_p2 = por %p822_p6, %p821_p8 }
  0x47   : > { %p824_p5 = pnand %p823_p2, %p817_p11 }
  0x49   : > { %827 = shalt.err (!%p824_p5)
}
  0x4a   : > { %707 = dma.hbm_to_vmem [thread:$0]  (!%p1015_p13), %s1060_s16, 128, %s169_s19, %s155_s30  }
  0x4b   : > { %p1249_p12 = scmp.ne.s32.totalorder %s1248_s29, 0 }
  0x4c   : > { %s1085_s15 = sand.u32 (!%p1249_p12), 1, %s898_s10   ;;  %p1250_p3 = scmp.ne.s32.totalorder (!%p1249_p12), %s1242_s21, 0 }
  0x4d   : > { %177 = sbr.rel (%p1249_p12) target bundleno = 471 (0x1d7), region = 28  ;;  %s680_s18 = sshll.u32 (!%p1249_p12), %s1085_s15, 4 }
  0x4e   : > { %s180_s4 = scalar_lea.sflag (!%p1249_p12), [#allocation7], %s1085_s15  ;;  %s183_s6 = scalar_lea.vmem (!%p1249_p12), [#allocation6], %s680_s18 }
  0x54   : > { %881 = dma.done.wait (%p1250_p3), %s180_s4, 256  }
  0x55   : > { %883 = vsyncadd (%p1250_p3), %s180_s4, 4294967040  ;;  %s681_s5 = sshll.u32 %s1085_s15, 3  ;;  %s189_s29 = scalar_lea.sflag [#allocation10], %s1085_s15 }
  0x56   : > { %s192_s16 = scalar_lea.vmem [#allocation9], %s681_s5 }
  0x57   : > { %885 = dma.done.wait (%p1250_p3), %s189_s29, 128  }
  0x58   : > { %887 = vsyncadd (%p1250_p3), %s189_s29, 4294967168  ;;  %v229_v0 = vlaneseq  ;;  %v918_v1 = vmov 1966171168   ;;  %v919_v5 = vmov 0.0   ;;  %v1113_v8 = vld [vmem:[%s183_s6] sm:$0xff]  ;;  %v1115_v9 = vld [vmem:[%s183_s6 + $0x8] sm:$0xff] }
  0x59   : > { %v240_v2 = vunpack.c.l.s4 %v918_v1  ;;  %s920_s21 = smov 1   ;;  %s921_s19 = smov 16   ;;  %v238_v10 = vcombine.low %v1113_v8, %v1115_v9  ;;  %v220_v13 = vld [vmem:[%s192_s16] sm:$0xff]  ;;  %v401_v16 = vrot.slane %v1113_v8, 7  ;;  %v402_v17 = vrot.slane %v1115_v9, 7 }
  0x5a   : > { %vm1100_vm0 = vcmp.lt.s32.totalorder %v229_v0, 256  ;;  %v243_v4 = vshrl.u32 %v229_v0, 7  ;;  %258 = vrot.lane.b32.xlu1 %v1113_v8, %s920_s21  ;;  %336 = vrot.lane.b32.xlu0 %v1113_v8, %s921_s19  ;;  %v221_v18 = vunpack.c.l.bf16 %v220_v13  ;;  %v222_v19 = vunpack.c.h.bf16 %v220_v13  ;;  %s682_s30 = sshll.u32 %s1085_s15, 2  ;;  %s684_s26 = sshll.u32 %s906_s12, 6 }
  0x5b   : > { %233 = vst.msk [vmem:[#allocation2] sm:$0x3] %vm1100_vm0, %v919_v5  ;;  %235 = vst.msk [vmem:[#allocation4] sm:$0x3] %vm1100_vm0, %v919_v5  ;;  %v241_v6 = vunpack.c.0.s8 %v240_v2  ;;  %v446_v23 = vcombine.high %v1113_v8, %v1115_v9  ;;  %vm480_vm2 = vcmask 1040384   ;;  %v256_v61 = vand.u32 127, %v229_v0  ;;  %s1188_s18 = scalar_lea.hbm %s1238_s2, %s684_s26 }
  0x5c   : > { %234 = vst.msk [vmem:[#allocation3] sm:$0x3] %vm1100_vm0, %v919_v5  ;;  %v1127_v14 = vsub.s32 0, %v243_v4  ;;  %v1129_v15 = vsub.s32 1, %v243_v4  ;;  %vm389_vm1 = vcmp.eq.s32.totalorder %v243_v4, 0  ;;  %v1137_v26 = vsub.f32 1.0, %v221_v18 }
  0x5d   : > { %v1111_v7 = vsub.s32 %v241_v6, %v243_v4  ;;  %v1139_v27 = vsub.f32 1.0, %v222_v19  ;;  %v257_v1 = vadd.s32 128, %v256_v61  ;;  %vm262_vm3 = vcmp.lt.s32.totalorder %v256_v61, 1  ;;  %s217_s27 = scalar_lea.vmem [#allocation11], %s682_s30  ;;  %s549_s12 = scalar_lea.sflag [#allocation8], %s1085_s15 }
  0x5e   : > { %260 = vrot.lane.b32.xlu1 %v1115_v9, %s920_s21  ;;  %338 = vrot.lane.b32.xlu0 %v1115_v9, %s921_s19  ;;  %vm340_vm4 = vcmp.lt.s32.totalorder %v256_v61, 16  ;;  %v272_v2 = vand.u32 15, %v256_v61  ;;  %vm346_vm7 = vcmp.ge.s32.totalorder %v256_v61, 16  ;;  %s562_s28 = sshll.u32 %s217_s27, 4  ;;  %vm545_vm8 = vcmask 1041408   ;;  %p1253_p13 = scmp.ne.s32.totalorder %s1243_s22, 0  ;;  %s1190_s28 = int_to_ptr.vmem [resolvable:$true] %s562_s28 }
  0x5f   : > { %v245_v11 = vrot.slane %v238_v10, %v1111_v7  ;;  %v453_v32 = vrot.slane %v446_v23, %v1111_v7  ;;  %v279_v4 = vand.u32 15, %v257_v1  ;;  %s828_s4 = scalar_lea.vmem %s1190_s28, 64  ;;  %s922_s6 = smov [#allocation11]  }
  0x60   : > { %vm292_vm5 = vcmp.ne.s32.totalorder %v272_v2, 0  ;;  %p829_p8 = scmp.ne.s32.totalorder %s1190_s28, %s828_s4  ;;  %s832_s5 = sshll.u32 %s922_s6, 4  ;;  %s833_s5 = int_to_ptr.vmem [resolvable:$false] %s832_s5 }
  0x61   : > { %v252_v12 = vrot.slane %v245_v11, %v1111_v7  ;;  %v454_v35 = vcombine.high %v453_v32, %v453_v32  ;;  %vm293_vm6 = vcmp.ne.s32.totalorder %v279_v4, 0  ;;  %s834_s29 = scalar_lea.vmem %s833_s5, 128  ;;  %p835_p7 = scmp.lt.s32.totalorder %s1190_s28, %s833_s5 }
  0x62   : > { %v405_v52 = vld [vmem:[#allocation2] sm:$0x3]  ;;  %p830_p6 = pnand %p829_p8, %p1253_p13  ;;  %p836_p10 = scmp.lt.s32.totalorder %s834_s29, %s828_s4 }
  0x63   : > { %254 = vst.msk [vmem:[#allocation5] sm:$0x3] %vm1100_vm0, %v252_v12  ;;  %v461_v38 = vrot.slane %v454_v35, %v1111_v7 }
  0x64   : > { %p831_p4 = pneg %p830_p6  ;;  %p837_p0 = por %p836_p10, %p835_p7 }
  0x65   : > { %v462_v41 = vcombine.high %v461_v38, %v461_v38 }
  0x66   : > { %p838_p1 = pnand %p837_p0, %p831_p4 }
  0x6a   : > { %v386_v20 = vld [vmem:[#allocation5] sm:$0x3] }
  0x6b   : > { %v394_v21 = vrot.slane %v386_v20, %v1127_v14  ;;  %v398_v22 = vrot.slane %v386_v20, %v1129_v15  ;;  %464 = vst.msk [vmem:[#allocation5] sm:$0x3] %vm1100_vm0, %v462_v41 }
  0x6d   : > { %v403_v24 = vsel %vm389_vm1, %v394_v21, %v401_v16  ;;  %v404_v25 = vsel %vm389_vm1, %v398_v22, %v402_v17 }
  0x6e   : > { %v406_v28 = vsub.f32 %v1113_v8, %v403_v24  ;;  %v407_v29 = vsub.f32 %v1115_v9, %v404_v25 }
  0x70   : > { %v408_v30 = vand.u32 2147483647, %v406_v28  ;;  %v409_v31 = vand.u32 2147483647, %v407_v29 }
  0x72   : > { %v410_v33 = vmul.f32 %v408_v30, %v1137_v26  ;;  %v411_v34 = vmul.f32 %v409_v31, %v1139_v27 }
  0x74   : > { %v412_v36 = vrot.slane %v410_v33, 4  ;;  %v418_v37 = vrot.slane %v411_v34, 4 }
  0x76   : > { %v413_v39 = vadd.f32 %v412_v36, %v410_v33  ;;  %v419_v40 = vadd.f32 %v418_v37, %v411_v34 }
  0x78   : > { %v414_v42 = vrot.slane %v413_v39, 2  ;;  %v420_v43 = vrot.slane %v419_v40, 2 }
  0x7a   : > { %v415_v44 = vadd.f32 %v414_v42, %v413_v39  ;;  %v421_v45 = vadd.f32 %v420_v43, %v419_v40 }
  0x7c   : > { %v416_v46 = vrot.slane %v415_v44, 1  ;;  %v422_v47 = vrot.slane %v421_v45, 1 }
  0x7e   : > { %v417_v48 = vadd.f32 %v416_v46, %v415_v44  ;;  %v423_v49 = vadd.f32 %v422_v47, %v421_v45 }
  0x80   : > { %v426_v50 = vcombine.low %v417_v48, %v423_v49 }
  0x82   : > { %v433_v51 = vrot.slane %v426_v50, %v1111_v7 }
  0x84   : > { %v440_v53 = vrot.slane %v433_v51, %v1111_v7 }
  0x86   : > { %v442_v54 = vadd.f32 %v440_v53, %v405_v52 }
  0x88   : > { %443 = vst.msk [vmem:[#allocation2] sm:$0x3] %vm1100_vm0, %v442_v54 }
  0x8f   : > { %v468_v55 = vld [vmem:[#allocation2] sm:$0x3] }
  0x90   : > { %v473_v56 = vrot.slane %v468_v55, %v1127_v14  ;;  %v477_v57 = vrot.slane %v468_v55, %v1129_v15 }
  0x92   : > { %v481_v58 = vsel %vm480_vm2, %v473_v56, 0.0  ;;  %v482_v59 = vsel %vm480_vm2, %v477_v57, 0.0  ;;  %v267_v56 = vld [vmem:[#allocation4] sm:$0x3]  ;;  %v345_v57 = vld [vmem:[#allocation3] sm:$0x3] }
  0x93   : > { %v483_v60 = vadd.f32 %v482_v59, %v481_v58 }
  0x95   : > { %484 = vadd.xlane.f32.xlu0 %v483_v60 }
  0xcc   : > { %v259_v62 = vpop.permute.xlu1 %258  ;;  %v337_v63 = vpop.permute.xlu0 %336 }
  0xd0   : > { %v261_v5 = vpop.permute.xlu1 %260  ;;  %v339_v6 = vpop.permute.xlu0 %338 }
  0xd1   : > { %v263_v10 = vsel %vm262_vm3, %v259_v62, %v261_v5  ;;  %v264_v11 = vsel %vm262_vm3, %v261_v5, %v259_v62  ;;  %v341_v12 = vsel %vm340_vm4, %v337_v63, %v339_v6  ;;  %v342_v13 = vsel %vm340_vm4, %v339_v6, %v337_v63 }
  0xd2   : > { %v265_v16 = vsub.f32 %v1113_v8, %v264_v11  ;;  %v266_v17 = vsub.f32 %v1115_v9, %v263_v10  ;;  %v343_v18 = vsub.f32 %v1113_v8, %v342_v13  ;;  %v344_v0 = vsub.f32 %v1115_v9, %v341_v12 }
  0xd4   : > { %v294_v19 = vand.u32 2147483647, %v265_v16  ;;  %v295_v20 = vand.u32 2147483647, %v266_v17  ;;  %v348_v21 = vand.u32 2147483647, %v343_v18 }
  0xd5   : > { %v349_v22 = vand.u32 2147483647, %v344_v0 }
  0xd6   : > { %v296_v23 = vmul.f32 %v294_v19, %v1137_v26  ;;  %v297_v24 = vmul.f32 %v295_v20, %v1139_v27  ;;  %v350_v25 = vmul.f32 %v348_v21, %v1137_v26 }
  0xd7   : > { %v351_v28 = vmul.f32 %v349_v22, %v1139_v27 }
  0xd8   : > { %v298_v29 = vsel %vm292_vm5, %v296_v23, 0.0  ;;  %v299_v30 = vsel %vm293_vm6, %v297_v24, 0.0  ;;  %v352_v8 = vsel %vm346_vm7, %v350_v25, 0.0 }
  0xd9   : > { %v300_v31 = vrot.slane %v298_v29, 4  ;;  %v306_v9 = vrot.slane %v299_v30, 4  ;;  %v354_v32 = vrot.slane %v352_v8, 4  ;;  %v360_v33 = vrot.slane %v351_v28, 4 }
  0xdb   : > { %v301_v34 = vadd.f32 %v300_v31, %v298_v29  ;;  %v307_v35 = vadd.f32 %v306_v9, %v299_v30  ;;  %v355_v36 = vadd.f32 %v354_v32, %v352_v8  ;;  %v361_v37 = vadd.f32 %v360_v33, %v351_v28 }
  0xdd   : > { %v302_v38 = vrot.slane %v301_v34, 2  ;;  %v308_v39 = vrot.slane %v307_v35, 2  ;;  %v356_v40 = vrot.slane %v355_v36, 2  ;;  %v362_v41 = vrot.slane %v361_v37, 2 }
  0xdf   : > { %v303_v42 = vadd.f32 %v302_v38, %v301_v34  ;;  %v309_v43 = vadd.f32 %v308_v39, %v307_v35  ;;  %v357_v26 = vadd.f32 %v356_v40, %v355_v36  ;;  %v363_v44 = vadd.f32 %v362_v41, %v361_v37 }
  0xe1   : > { %v304_v27 = vrot.slane %v303_v42, 1  ;;  %v310_v45 = vrot.slane %v309_v43, 1  ;;  %v358_v46 = vrot.slane %v357_v26, 1  ;;  %v364_v47 = vrot.slane %v363_v44, 1 }
  0xe3   : > { %v305_v48 = vadd.f32 %v304_v27, %v303_v42  ;;  %v311_v49 = vadd.f32 %v310_v45, %v309_v43  ;;  %v359_v50 = vadd.f32 %v358_v46, %v357_v26  ;;  %v365_v51 = vadd.f32 %v364_v47, %v363_v44 }
  0xe5   : > { %v314_v52 = vcombine.low %v305_v48, %v311_v49  ;;  %v368_v53 = vcombine.low %v359_v50, %v365_v51 }
  0xe7   : > { %v321_v54 = vrot.slane %v314_v52, %v1111_v7  ;;  %v375_v55 = vrot.slane %v368_v53, %v1111_v7 }
  0xe9   : > { %v328_v58 = vrot.slane %v321_v54, %v1111_v7  ;;  %v382_v59 = vrot.slane %v375_v55, %v1111_v7 }
  0xeb   : > { %v330_v60 = vadd.f32 %v328_v58, %v267_v56  ;;  %v384_v61 = vadd.f32 %v382_v59, %v345_v57 }
  0xed   : > { %335 = vst.msk [vmem:[#allocation4] sm:$0x3] %vm1100_vm0, %v330_v60  ;;  %385 = vst.msk [vmem:[#allocation3] sm:$0x3] %vm1100_vm0, %v384_v61 }
  0xf4   : > { %v494_v62 = vld [vmem:[#allocation3] sm:$0x3]  ;;  %v519_v63 = vld [vmem:[#allocation4] sm:$0x3] }
  0xf5   : > { %v499_v1 = vrot.slane %v494_v62, %v1127_v14  ;;  %v503_v2 = vrot.slane %v494_v62, %v1129_v15  ;;  %v524_v4 = vrot.slane %v519_v63, %v1127_v14  ;;  %v528_v5 = vrot.slane %v519_v63, %v1129_v15 }
  0xf7   : > { %v506_v7 = vsel %vm480_vm2, %v499_v1, 0.0  ;;  %v507_v6 = vsel %vm480_vm2, %v503_v2, 0.0  ;;  %v531_v10 = vsel %vm480_vm2, %v524_v4, 0.0  ;;  %v532_v11 = vsel %vm480_vm2, %v528_v5, 0.0 }
  0xf8   : > { %v508_v3 = vadd.f32 %v507_v6, %v506_v7  ;;  %v533_v12 = vadd.f32 %v532_v11, %v531_v10 }
  0xfa   : > { %509 = vadd.xlane.f32.xlu1 %v508_v3  ;;  %534 = vadd.xlane.f32.xlu0 %v533_v12 }
 0x122   : > { %v485_v13 = vpop.xlane.xlu0 %484 }
 0x123   : > { %v486_v16 = vrot.slane %v485_v13, 4 }
 0x125   : > { %v487_v17 = vadd.f32 %v486_v16, %v485_v13 }
 0x127   : > { %v488_v18 = vrot.slane %v487_v17, 2 }
 0x129   : > { %v489_v0 = vadd.f32 %v488_v18, %v487_v17 }
 0x12b   : > { %v490_v14 = vrot.slane %v489_v0, 1 }
 0x12d   : > { %v491_v19 = vadd.f32 %v490_v14, %v489_v0 }
 0x12f   : > { %689 = vpush %v491_v19 }
 0x160   : > { %s690_s20 = spop %689 }
 0x161   : > { %v493_v33 = vstv %s690_s20 }
 0x187   : > { %v510_v15 = vpop.xlane.xlu1 %509  ;;  %v535_v20 = vpop.xlane.xlu0 %534 }
 0x188   : > { %v511_v21 = vrot.slane %v510_v15, 4  ;;  %v536_v22 = vrot.slane %v535_v20, 4 }
 0x18a   : > { %v512_v23 = vadd.f32 %v511_v21, %v510_v15  ;;  %v537_v24 = vadd.f32 %v536_v22, %v535_v20 }
 0x18c   : > { %v513_v25 = vrot.slane %v512_v23, 2  ;;  %v538_v28 = vrot.slane %v537_v24, 2 }
 0x18e   : > { %v514_v29 = vadd.f32 %v513_v25, %v512_v23  ;;  %v539_v30 = vadd.f32 %v538_v28, %v537_v24 }
 0x190   : > { %v515_v8 = vrot.slane %v514_v29, 1  ;;  %v540_v31 = vrot.slane %v539_v30, 1 }
 0x192   : > { %v516_v9 = vadd.f32 %v515_v8, %v514_v29  ;;  %v541_v32 = vadd.f32 %v540_v31, %v539_v30 }
 0x194   : > { %691 = vpush %v516_v9 }
 0x195   : > { %693 = vpush %v541_v32 }
 0x1c5   : > { %s692_s25 = spop %691 }
 0x1c6   : > { %v518_v34 = vstv %s692_s25  ;;  %s694_s3 = spop %693 }
 0x1c7   : > { %v544_v35 = vsel %vm480_vm2, %v493_v33, %v518_v34  ;;  %v543_v36 = vstv %s694_s3 }
 0x1c8   : > { %v546_v37 = vsel %vm545_vm8, %v544_v35, %v543_v36 }
 0x1c9   : > { %547 = vst [vmem:[%s217_s27] sm:$0x7] %v546_v37 }
 0x1ca   : > { %841 = shalt.err (!%p838_p1)
}
 0x1cb   : > { %s842_s15 = scalar_lea.hbm %s1188_s18, 64  ;;  %s846_s19 = scalar_lea.hbm %s1238_s2, 384 }
 0x1cc   : > { %p843_p9 = scmp.ne.s32.totalorder %s1188_s18, %s842_s15  ;;  %p847_p5 = scmp.lt.u32.totalorder %s1188_s18, %s1238_s2 }
 0x1cd   : > { %p848_p12 = scmp.lt.u32.totalorder %s846_s19, %s842_s15  ;;  %p850_p8 = scmp.lt.u32.totalorder %s842_s15, %s1188_s18 }
 0x1ce   : > { %p844_p11 = pnand %p843_p9, %p1253_p13 }
 0x1cf   : > { %p849_p3 = por %p848_p12, %p847_p5 }
 0x1d0   : > { %p845_p2 = pneg %p844_p11 }
 0x1d1   : > { %p851_p6 = por %p850_p8, %p849_p3 }
 0x1d3   : > { %p852_p4 = pnand %p851_p6, %p845_p2 }
 0x1d5   : > { %855 = shalt.err (!%p852_p4)
}
 0x1d6   : > { %699 = dma.vmem_to_hbm [thread:$0]  (%p1253_p13), %s1190_s28, 64, %s1188_s18, %s549_s12  }
 0x1d7 PF: > { %p713_p7 = scmp.ge.s32.totalorder %s914_s14, 2  ;;  %s574_s26 = sand.u32 1, %s894_s9  }
 0x1d8   : > { %p1254_p10 = scmp.ne.s32.totalorder %s1244_s24, 0  ;;  %s575_s27 = scalar_lea.sflag [#allocation8], %s574_s26 }
 0x1da   : > { %p709_p0 = pnand %p713_p7, %p1254_p10 }
 0x1dc   : > { %889 = dma.done.wait (!%p709_p0), %s575_s27, 64  }
 0x1dd   : > { %891 = vsyncadd (!%p709_p0), %s575_s27, 4294967232  ;;  %s21_s14 = sadd.s32 1, %s914_s14   ;;  %s1255_s9 = smov %s898_s10 }
 0x1de   : > { %p18_p1 = scmp.ge.s32.totalorder %s21_s14, 8   ;;  %s1256_s10 = smov %s902_s11 }
 0x1df   : > { %s1257_s11 = smov %s994_s23  ;;  %s1258_s12 = smov %s910_s13 }
 0x1e0   : > { %s1259_s13 = smov %s1261_s17  ;;  %20 = sbr.rel (!%p18_p1) target bundleno = 8 (0x8), region = 94 }
 0x1e7   :  { %580 = vsyncpa [#allocation7], 1 }
 0x1e8   :  { %582 = vsyncpa [#allocation7 + $0x1], 1 }
 0x1e9   :  { %583 = vsyncpa [#allocation10], 1 }
 0x1ea   :  { %585 = vsyncpa [#allocation10 + $0x1], 1 }
 0x1eb   :  { %586 = vsyncpa [#allocation8], 1 }
 0x1ec   :  { %588 = vsyncpa [#allocation8 + $0x1], 1 }

</bundles_post_ra>
